<compile_context>
chip_gen: v6e
topology: v6e:2x2x1
jax: 0.10.0
libtpu: 0.0.40
codegen_flags: <defaults>
</compile_context>

<pallas_src>
import functools

import jax
import jax.numpy as jnp
from jax.experimental import pallas as pl
from jax.experimental.pallas import tpu as pltpu

LANE = 128  # TPU lane width; hidden/output feature dims are zero-padded to this.


def _round_up(x, m):
    return ((x + m - 1) // m) * m


def dqn_kernel(x_ref, w_ref, b_ref, o_ref, *, d_in):
    # x_ref: (TILE_B, d_in) f32   -- raw input features (batch-padded only)
    # w_ref: (3, 128, 128) bf16   -- zero-padded W1 | W2 | W3 slab (resident)
    # b_ref: (8, 128)      f32    -- rows 0..2 = zero-padded b1, b2, b3
    # o_ref: (TILE_B, 128) bf16   -- zero-padded action values (lane-dense store)
    x = x_ref[...].astype(jnp.bfloat16)                        # (TILE_B, d_in)
    w1 = w_ref[0, :d_in, :]                    # static sublane slice (d_in % 8 == 0)
    h1 = jnp.dot(x, w1, preferred_element_type=jnp.float32) + b_ref[0:1, :]
    h1 = jnp.maximum(h1, 0.0)                                   # F.relu(fc1(x))
    h2 = jnp.dot(h1.astype(jnp.bfloat16), w_ref[1],
                 preferred_element_type=jnp.float32) + b_ref[1:2, :]
    h2 = jnp.maximum(h2, 0.0)                                   # F.relu(fc2(x))
    out = jnp.dot(h2.astype(jnp.bfloat16), w_ref[2],
                  preferred_element_type=jnp.float32) + b_ref[2:3, :]
    o_ref[...] = out.astype(o_ref.dtype)                        # fc3(x)


def _default_tile_b(batch):
    # Two grid steps for typical batches (so v7x can shard the "parallel" axis
    # across both TensorCores) but each tile as large as possible, since fixed
    # per-step overhead dominates this micro-kernel on single-core v5e/v6e.
    return max(8, min(2048, _round_up(pl.cdiv(batch, 2), 8)))


def deep_q_network_forward(states, packed, *, tile_b=None):
    """states: [B, d_in] float32; packed: dict from pack_params().
    Returns float32 [B, n_actions] action values, matching the nn.Module."""
    w_slab, b_slab = packed["w_slab"], packed["b_slab"]
    d_in, fc1, fc2, n_actions = packed["dims"]
    d_in_p = packed["d_in_padded"]
    B = states.shape[0]

    if tile_b is None:
        tile_b = _default_tile_b(B)
    n_tiles = pl.cdiv(B, tile_b)
    Bp = n_tiles * tile_b

    # Pad only the batch axis (and the input dim up to a sublane multiple when
    # needed).  For sublane-aligned d_in and B % tile_b == 0 this is a no-op
    # and `states` is handed to pallas_call untouched.
    if (Bp, d_in_p) != states.shape:
        x = jnp.zeros((Bp, d_in_p), states.dtype).at[:B, :d_in].set(states)
    else:
        x = states

    cost = pl.CostEstimate(
        # Actual (padded) MXU work: K=d_in_p on layer 1, K=N=128 on layers 2/3.
        flops=2 * Bp * (d_in_p * LANE + LANE * LANE + LANE * LANE),
        transcendentals=0,
        bytes_accessed=(x.size * x.dtype.itemsize      # f32 input, read once
                        + w_slab.size * 2              # bf16 weight slab
                        + b_slab.size * 4              # f32 bias slab
                        + Bp * LANE * 2),              # bf16 output
    )

    kernel = functools.partial(dqn_kernel, d_in=d_in_p)
    out_padded = pl.pallas_call(
        kernel,
        out_shape=jax.ShapeDtypeStruct((Bp, LANE), jnp.bfloat16),
        grid=(n_tiles,),
        in_specs=[
            pl.BlockSpec((tile_b, d_in_p), lambda i: (i, 0)),     # activations
            pl.BlockSpec((3, LANE, LANE), lambda i: (0, 0, 0)),   # weights (resident)
            pl.BlockSpec((8, LANE), lambda i: (0, 0)),            # biases  (resident)
        ],
        out_specs=pl.BlockSpec((tile_b, LANE), lambda i: (i, 0)),
        compiler_params=pltpu.CompilerParams(
            dimension_semantics=("parallel",)),
        cost_estimate=cost,
    )(x, w_slab, b_slab)

    # TODO(synk): for DQN training/action selection, fuse the consumer (argmax
    # over actions or the Q(s,a) gather) into the kernel so only [B,1] real
    # data leaves HBM; a dense slice is kept here to preserve forward()'s
    # [B, n_actions] contract.
    return out_padded[:B, :n_actions].astype(jnp.float32)


def init_params(key, input_dim, fc1_dims, fc2_dims, n_actions):
    """nn.Linear-style init (uniform +-1/sqrt(fan_in)); weights stored
    pre-transposed to [fan_in, fan_out] so the kernel does y = x @ W + b."""
    ks = jax.random.split(key, 6)

    def linear(kw, kb, fan_in, fan_out):
        bound = 1.0 / jnp.sqrt(fan_in)
        w = jax.random.uniform(kw, (fan_in, fan_out), jnp.float32, -bound, bound)
        b = jax.random.uniform(kb, (fan_out,), jnp.float32, -bound, bound)
        return w, b

    w1, b1 = linear(ks[0], ks[1], input_dim, fc1_dims)
    w2, b2 = linear(ks[2], ks[3], fc1_dims, fc2_dims)
    w3, b3 = linear(ks[4], ks[5], fc2_dims, n_actions)
    return {"w1": w1, "b1": b1, "w2": w2, "b2": b2, "w3": w3, "b3": b3}


def pack_params(params, d_in, fc1, fc2, n_act):
    """One-time packing: all weights into a single bf16 [3,128,128] slab and
    all biases into a single f32 [8,128] slab, zero-padded to lane width."""
    assert max(d_in, fc1, fc2, n_act) <= LANE, "pad scheme assumes dims <= 128"
    d_in_p = _round_up(d_in, 8)  # sublane-aligned K for the layer-1 slice
    w_slab = jnp.zeros((3, LANE, LANE), jnp.bfloat16)
    w_slab = w_slab.at[0, :d_in, :fc1].set(params["w1"].astype(jnp.bfloat16))
    w_slab = w_slab.at[1, :fc1, :fc2].set(params["w2"].astype(jnp.bfloat16))
    w_slab = w_slab.at[2, :fc2, :n_act].set(params["w3"].astype(jnp.bfloat16))
    b_slab = jnp.zeros((8, LANE), jnp.float32)
    b_slab = b_slab.at[0, :fc1].set(params["b1"])
    b_slab = b_slab.at[1, :fc2].set(params["b2"])
    b_slab = b_slab.at[2, :n_act].set(params["b3"])
    return {"w_slab": w_slab, "b_slab": b_slab,
            "dims": (d_in, fc1, fc2, n_act), "d_in_padded": d_in_p}


if __name__ == "__main__":
    # Shapes consistent with DeepQNetwork(lr, input_dims=(16,), fc1=32, fc2=32,
    # n_actions=8); batch of 256 replay transitions -> default tile picker
    # gives 2 tiles of 128, exercising the "parallel" batch grid.
    B, D_IN, FC1, FC2, N_ACT = 256, 16, 32, 32, 8

    key = jax.random.PRNGKey(0)
    k_states, k_params = jax.random.split(key)
    states = jax.random.normal(k_states, (B, D_IN), jnp.float32)
    params = init_params(k_params, D_IN, FC1, FC2, N_ACT)
    packed = pack_params(params, D_IN, FC1, FC2, N_ACT)

    actions = deep_q_network_forward(states, packed)
    jax.block_until_ready(actions)

    # Pure-JAX reference mirroring the kernel's bf16-matmul / f32-accumulate /
    # f32-epilogue / bf16-store pipeline.
    f32 = jnp.float32
    xs = states.astype(jnp.bfloat16).astype(f32)
    w1 = params["w1"].astype(jnp.bfloat16).astype(f32)
    w2 = params["w2"].astype(jnp.bfloat16).astype(f32)
    w3 = params["w3"].astype(jnp.bfloat16).astype(f32)
    h1 = jnp.maximum(xs @ w1 + params["b1"], 0.0)
    h2 = jnp.maximum(h1.astype(jnp.bfloat16).astype(f32) @ w2 + params["b2"], 0.0)
    ref = h2.astype(jnp.bfloat16).astype(f32) @ w3 + params["b3"]
    ref = ref.astype(jnp.bfloat16).astype(f32)

    assert actions.shape == (B, N_ACT)
    assert jnp.allclose(actions, ref, atol=1e-2, rtol=1e-2)

    # TODO(synk): optimizer (Adam), MSELoss and device placement from the
    # PyTorch module are training machinery, not part of forward(); not ported.
    print("KERNEL_OK")
</pallas_src>

<mosaic_0001>
module attributes {stable_mosaic.version = 11 : i64} {
  func.func @dqn_kernel(%arg0: i32, %arg1: memref<128x16xf32, #tpu.memory_space<vmem>>, %arg2: memref<3x128x128xbf16, #tpu.memory_space<vmem>>, %arg3: memref<8x128xf32, #tpu.memory_space<vmem>>, %arg4: memref<128x128xbf16, #tpu.memory_space<vmem>>) attributes {dimension_semantics = [#tpu.dimension_semantics<parallel>], iteration_bounds = array<i64: 2>, scalar_prefetch = 0 : i64, scratch_operands = 0 : i64, tpu.core_type = #tpu.core_type<tc>, window_params = [{transform_indices = @transform_0, window_bounds = array<i64: 128, 16>}, {pipeline_mode = #tpu.pipeline_mode<synchronous>, transform_indices = @transform_1, window_bounds = array<i64: 3, 128, 128>}, {pipeline_mode = #tpu.pipeline_mode<synchronous>, transform_indices = @transform_2, window_bounds = array<i64: 8, 128>}, {transform_indices = @transform_3, window_bounds = array<i64: 128, 128>}]} {
    %c0 = arith.constant 0 : index
    %c0_0 = arith.constant 0 : index
    %0 = vector.load %arg1[%c0, %c0_0] : memref<128x16xf32, #tpu.memory_space<vmem>>, vector<128x16xf32>
    %1 = arith.truncf %0 : vector<128x16xf32> to vector<128x16xbf16>
    %c0_1 = arith.constant 0 : index
    %c0_2 = arith.constant 0 : index
    %c0_3 = arith.constant 0 : index
    %2 = vector.load %arg2[%c0_1, %c0_2, %c0_3] : memref<3x128x128xbf16, #tpu.memory_space<vmem>>, vector<1x16x128xbf16>
    %3 = vector.shape_cast %2 : vector<1x16x128xbf16> to vector<16x128xbf16>
    %cst = arith.constant dense<0.000000e+00> : vector<128x128xf32>
    %4 = tpu.matmul %1, %3, %cst {dimension_numbers = #tpu.dot_dimension_numbers<[1], [0], [0], [1], [0, 0, 1, 1], [], []>} : vector<128x16xbf16>, vector<16x128xbf16>, vector<128x128xf32> -> vector<128x128xf32>
    %c0_4 = arith.constant 0 : index
    %c0_5 = arith.constant 0 : index
    %5 = vector.load %arg3[%c0_4, %c0_5] : memref<8x128xf32, #tpu.memory_space<vmem>>, vector<1x128xf32>
    %6 = vector.broadcast %5 : vector<1x128xf32> to vector<128x128xf32>
    %7 = arith.addf %4, %6 : vector<128x128xf32>
    %cst_6 = arith.constant 0.000000e+00 : f32
    %8 = vector.broadcast %cst_6 : f32 to vector<128x128xf32>
    %9 = arith.maximumf %7, %8 : vector<128x128xf32>
    %10 = arith.truncf %9 : vector<128x128xf32> to vector<128x128xbf16>
    %c1 = arith.constant 1 : index
    %c0_7 = arith.constant 0 : index
    %c0_8 = arith.constant 0 : index
    %11 = vector.load %arg2[%c1, %c0_7, %c0_8] : memref<3x128x128xbf16, #tpu.memory_space<vmem>>, vector<1x128x128xbf16>
    %12 = vector.shape_cast %11 : vector<1x128x128xbf16> to vector<128x128xbf16>
    %cst_9 = arith.constant dense<0.000000e+00> : vector<128x128xf32>
    %13 = tpu.matmul %10, %12, %cst_9 {dimension_numbers = #tpu.dot_dimension_numbers<[1], [0], [0], [1], [0, 0, 1, 1], [], []>} : vector<128x128xbf16>, vector<128x128xbf16>, vector<128x128xf32> -> vector<128x128xf32>
    %c1_10 = arith.constant 1 : index
    %c0_11 = arith.constant 0 : index
    %14 = vector.load %arg3[%c1_10, %c0_11] : memref<8x128xf32, #tpu.memory_space<vmem>>, vector<1x128xf32>
    %15 = vector.broadcast %14 : vector<1x128xf32> to vector<128x128xf32>
    %16 = arith.addf %13, %15 : vector<128x128xf32>
    %cst_12 = arith.constant 0.000000e+00 : f32
    %17 = vector.broadcast %cst_12 : f32 to vector<128x128xf32>
    %18 = arith.maximumf %16, %17 : vector<128x128xf32>
    %19 = arith.truncf %18 : vector<128x128xf32> to vector<128x128xbf16>
    %c2 = arith.constant 2 : index
    %c0_13 = arith.constant 0 : index
    %c0_14 = arith.constant 0 : index
    %20 = vector.load %arg2[%c2, %c0_13, %c0_14] : memref<3x128x128xbf16, #tpu.memory_space<vmem>>, vector<1x128x128xbf16>
    %21 = vector.shape_cast %20 : vector<1x128x128xbf16> to vector<128x128xbf16>
    %cst_15 = arith.constant dense<0.000000e+00> : vector<128x128xf32>
    %22 = tpu.matmul %19, %21, %cst_15 {dimension_numbers = #tpu.dot_dimension_numbers<[1], [0], [0], [1], [0, 0, 1, 1], [], []>} : vector<128x128xbf16>, vector<128x128xbf16>, vector<128x128xf32> -> vector<128x128xf32>
    %c2_16 = arith.constant 2 : index
    %c0_17 = arith.constant 0 : index
    %23 = vector.load %arg3[%c2_16, %c0_17] : memref<8x128xf32, #tpu.memory_space<vmem>>, vector<1x128xf32>
    %24 = vector.broadcast %23 : vector<1x128xf32> to vector<128x128xf32>
    %25 = arith.addf %22, %24 : vector<128x128xf32>
    %26 = arith.truncf %25 : vector<128x128xf32> to vector<128x128xbf16>
    %c0_18 = arith.constant 0 : index
    %c0_19 = arith.constant 0 : index
    %27 = vector.load %arg4[%c0_18, %c0_19] : memref<128x128xbf16, #tpu.memory_space<vmem>>, vector<128x128xbf16>
    tpu.vector_store %arg4[%c0_18, %c0_19], %26 {strides = array<i32>} : memref<128x128xbf16, #tpu.memory_space<vmem>>, vector<128x128xbf16>,
    return
  }
  func.func @transform_0(%arg0: i32) -> (i32, i32) {
    %c0_i32 = arith.constant 0 : i32
    %c0_i32_0 = arith.constant 0 : i32
    return %arg0, %c0_i32 : i32, i32
  }
  func.func @transform_1(%arg0: i32) -> (i32, i32, i32) {
    %c0_i32 = arith.constant 0 : i32
    %c0_i32_0 = arith.constant 0 : i32
    %c0_i32_1 = arith.constant 0 : i32
    %c0_i32_2 = arith.constant 0 : i32
    return %c0_i32, %c0_i32_0, %c0_i32_1 : i32, i32, i32
  }
  func.func @transform_2(%arg0: i32) -> (i32, i32) {
    %c0_i32 = arith.constant 0 : i32
    %c0_i32_0 = arith.constant 0 : i32
    %c0_i32_1 = arith.constant 0 : i32
    return %c0_i32, %c0_i32_0 : i32, i32
  }
  func.func @transform_3(%arg0: i32) -> (i32, i32) {
    %c0_i32 = arith.constant 0 : i32
    %c0_i32_0 = arith.constant 0 : i32
    return %arg0, %c0_i32 : i32, i32
  }
}

</mosaic_0001>

<bundles_post_ra>
// kernel: tpu_custom_call.1
= control target key start
LH: loop header
LB: loop body
LE: loop exit
PB: predicated region body
PF: predicated region fallthrough
CT: control target
= control target key end

     0   :  { %8 = vsyncpa [#allocation3], 0  ;;  %s1490_s0 = inlined_call_operand.vmem [shape: f32[256,16], index: 0, kind: input, shape index: {}]   ;;  %s1491_s1 = inlined_call_operand.vmem [shape: bf16[3,128,128], index: 1, kind: input, shape index: {}]   ;;  %s1492_s2 = inlined_call_operand.vmem [shape: f32[8,128], index: 2, kind: input, shape index: {}]   ;;  %s1493_s3 = inlined_call_operand.hbm [shape: bf16[256,128], index: 3, kind: output, shape index: {}]  }
   0x1   :  { %10 = vsyncpa [#allocation3 + $0x1], 0  ;;  %s1288_s12 = smov 0   ;;  %s1290_s13 = smov 0  }
   0x2   :  { %s1292_s14 = smov 0   ;;  %s1294_s15 = smov 0  }
   0x3 LB: > { %s1309_s16 = sadd.s32 4294967295, %s1263_s15   ;;  %s870_s17 = sadd.s32 4294967294, %s1263_s15   ;;  %s1263_s15 = sphi %s1294_s15, %s1499_s15   ;;  %s1259_s14 = sphi %s1292_s14, %s1498_s14   ;;  %s1255_s13 = sphi %s1290_s13, %s1497_s13   ;;  %s1251_s12 = sphi %s1288_s12, %s1496_s12  }
   0x4   : > { %s1313_s18 = sadd.s32 1, %s1263_s15   ;;  %s91_s19 = sadd.s32 1, %s1259_s14 }
   0x5   : > { %s88_s20 = ssub.s32 %s1263_s15, %s1313_s18  ;;  %p101_p0 = scmp.ne.s32.totalorder %s1259_s14, %s1255_s13 }
   0x6   : > { %p89_p1 = scmp.eq.s32.totalorder %s88_s20, 0  ;;  %p102_p2 = scmp.eq.s32.totalorder %s1309_s16, 1 }
   0x7   : > { %p107_p3 = scmp.ne.s32.totalorder %s1255_s13, %s1251_s12  ;;  %p108_p4 = scmp.eq.s32.totalorder %s870_s17, 1 }
   0x8   : > { %s1324_s21 = scalar_select %p89_p1, %s1259_s14, %s91_s19  }
   0x9   : > { %p1326_p5 = por %p102_p2, %p101_p0  ;;  %p1330_p6 = por %p108_p4, %p107_p3 }
   0xa   : > { %p873_p7 = scmp.ge.s32.totalorder %s1263_s15, 1  ;;  %p141_p8 = scmp.lt.s32.totalorder %s1263_s15, 3 }
   0xc   : > { %p142_p9 = pnand %p873_p7, %p141_p8 }
   0xd   : > { %s875_s26 = sshll.u32 (!%p142_p9), %s1309_s16, 4  ;;  %s974_s9 = sshll.u32 (!%p142_p9), %s1309_s16, 10 }
   0xe   : > { %145 = sbr.rel (%p142_p9) target bundleno = 679 (0x2a7), region = 32  ;;  %p166_p10 = scmp.lt.s32.totalorder (!%p142_p9), %s875_s26, 31 }
   0xf   : > { %s1442_s19 = scalar_lea.hbm (!%p142_p9), %s1493_s3, %s974_s9  ;;  %s1265_s24 = smov (!%p142_p9), [#allocation2]  }
  0x10   : > { %s1207_s25 = sshll.u32 (!%p142_p9), %s1265_s24, 4  ;;  %s1208_s25 = int_to_ptr.vmem [resolvable:$false] %s1207_s25 }
  0x13   : > { %v1186_v0 = vld [vmem:[%s1491_s1] sm:$0xff]   ;;  %v1187_v1 = vld [vmem:[%s1491_s1 + $0x78] sm:$0xff]   ;;  %s1501_s26 = smov (!%p166_p10, %s875_s26), 31  ;;  %v1188_v2 = vld [vmem:[%s1491_s1 + $0x70] sm:$0xff]   ;;  %vm210_vm0 = vcmask 130048  }
  0x14   : > { %1063 = vmatprep.subr.bf16.mxu0 %v1186_v0  ;;  %1081 = vmatprep.subr.bf16.mxu1 %v1187_v1  ;;  %s876_s4 = sshll.u32 %s1501_s26, 3  ;;  %v1189_v3 = vld [vmem:[%s1491_s1 + $0x68] sm:$0xff]   ;;  %v1190_v13 = vld [vmem:[%s1491_s1 + $0x60] sm:$0xff]   ;;  %v1191_v18 = vld [vmem:[%s1491_s1 + $0x58] sm:$0xff]   ;;  %s1209_s26 = scalar_lea.vmem %s1208_s25, 2048 }
  0x15   : > { %1064 = vmatpush3.bf16.msra.mxu0 %v1186_v0  ;;  %1082 = vmatpush3.bf16.msra.mxu1 %v1187_v1  ;;  %s1349_s7 = scalar_lea.vmem %s1490_s0, %s876_s4  ;;  %v1192_v30 = vld [vmem:[%s1491_s1 + $0x50] sm:$0xff]   ;;  %v1193_v31 = vld [vmem:[%s1491_s1 + $0x48] sm:$0xff]   ;;  %v1194_v32 = vld [vmem:[%s1491_s1 + $0x40] sm:$0xff]   ;;  %s162_s4 = sand.u32 1, %s1255_s13  }
  0x16   : > { %1083 = vmatprep.subr.bf16.mxu1 %v1188_v2  ;;  %v173_v4 = vld [vmem:[%s1349_s7] sm:$0xff]  ;;  %v174_v5 = vld [vmem:[%s1349_s7 + $0x8] sm:$0xff]  ;;  %v175_v6 = vld [vmem:[%s1349_s7 + $0x10] sm:$0xff]  ;;  %s1450_s16 = scalar_lea.sflag [#allocation3], %s162_s4 }
  0x17   : > { %v189_v7 = vpack.c.bf16 %v174_v5, %v173_v4  ;;  %v176_v8 = vld [vmem:[%s1349_s7 + $0x18] sm:$0xff]  ;;  %v177_v9 = vld [vmem:[%s1349_s7 + $0x20] sm:$0xff]  ;;  %v178_v10 = vld [vmem:[%s1349_s7 + $0x28] sm:$0xff] }
  0x18   : > { %v190_v11 = vpack.c.bf16 %v176_v8, %v175_v6  ;;  %v191_v12 = vpack.c.bf16 %v178_v10, %v177_v9  ;;  %v179_v14 = vld [vmem:[%s1349_s7 + $0x30] sm:$0xff]  ;;  %v180_v15 = vld [vmem:[%s1349_s7 + $0x38] sm:$0xff]  ;;  %v181_v16 = vld [vmem:[%s1349_s7 + $0x40] sm:$0xff] }
  0x19   : > { %1084 = vmatpush3.bf16.msra.mxu1 %v1188_v2  ;;  %1065 = vmatprep.mubr.msk.bf16.mxu0 %vm210_vm0, %v189_v7  ;;  %v182_v17 = vld [vmem:[%s1349_s7 + $0x48] sm:$0xff]  ;;  %v192_v19 = vpack.c.bf16 %v180_v15, %v179_v14  ;;  %v183_v21 = vld [vmem:[%s1349_s7 + $0x50] sm:$0xff]  ;;  %v184_v22 = vld [vmem:[%s1349_s7 + $0x58] sm:$0xff] }
  0x1a   : > { %1085 = vmatprep.subr.bf16.mxu1 %v1189_v3  ;;  %1066 = vmatmul.mubr.msk.bf16.vlgmr.msra.gmra.mxu0 %vm210_vm0, %v190_v11  ;;  %v193_v20 = vpack.c.bf16 %v182_v17, %v181_v16  ;;  %v185_v23 = vld [vmem:[%s1349_s7 + $0x60] sm:$0xff]  ;;  %v186_v24 = vld [vmem:[%s1349_s7 + $0x68] sm:$0xff]  ;;  %v194_v25 = vpack.c.bf16 %v184_v22, %v183_v21  ;;  %v187_v27 = vld [vmem:[%s1349_s7 + $0x70] sm:$0xff] }
  0x1b   : > { %1069 = vmatprep.mubr.msk.bf16.mxu0 %vm210_vm0, %v191_v12  ;;  %v195_v26 = vpack.c.bf16 %v186_v24, %v185_v23  ;;  %v188_v28 = vld [vmem:[%s1349_s7 + $0x78] sm:$0xff]  ;;  %v1196_v34 = vld [vmem:[%s1491_s1 + $0xb0] sm:$0xff]   ;;  %v1197_v35 = vld [vmem:[%s1491_s1 + $0xa8] sm:$0xff]   ;;  %s874_s7 = sshll.u32 %s162_s4, 6 }
  0x1c   : > { %v196_v29 = vpack.c.bf16 %v188_v28, %v187_v27  ;;  %v1195_v33 = vld [vmem:[%s1491_s1 + $0xb8] sm:$0xff]   ;;  %v1198_v36 = vld [vmem:[%s1491_s1 + $0xa0] sm:$0xff]   ;;  %s1429_s8 = scalar_lea.vmem [#allocation2], %s874_s7 }
  0x1d   : > { %1086 = vmatpush3.bf16.msra.mxu1 %v1189_v3  ;;  %1113 = vmatprep.subr.bf16.mxu0 %v1195_v33  ;;  %v1199_v37 = vld [vmem:[%s1491_s1 + $0x98] sm:$0xff]   ;;  %v877_v40 = vld [vmem:[%s1492_s2] ss:$0 sm:$0xff]  ;;  %s808_s10 = sshll.u32 %s1429_s8, 4  ;;  %s1444_s10 = int_to_ptr.vmem [resolvable:$true] %s808_s10 }
  0x1e   : > { %1087 = vmatprep.subr.bf16.mxu1 %v1190_v13  ;;  %1114 = vmatpush3.bf16.msra.mxu0 %v1195_v33  ;;  %v1202_v33 = vld [vmem:[%s1491_s1 + $0x80] sm:$0xff]   ;;  %s1203_s20 = scalar_lea.vmem %s1444_s10, 1024  ;;  %p1210_p0 = scmp.lt.s32.totalorder %s1444_s10, %s1208_s25 }
  0x1f   : > { %1115 = vmatprep.subr.bf16.mxu0 %v1196_v34  ;;  %p1204_p11 = scmp.ne.s32.totalorder %s1444_s10, %s1203_s20  ;;  %p1211_p1 = scmp.lt.s32.totalorder %s1209_s26, %s1203_s20 }
  0x21   : > { %1088 = vmatpush3.bf16.msra.mxu1 %v1190_v13  ;;  %p1205_p12 = pnand %p1204_p11, %p1326_p5  ;;  %p1212_p2 = por %p1211_p1, %p1210_p0 }
  0x22   : > { %1089 = vmatprep.subr.bf16.mxu1 %v1191_v18  ;;  %1070 = vmatmul.mubr.msk.bf16.gmra.mxu0 %vm210_vm0, %v192_v19 }
  0x23   : > { %1073 = vmatprep.mubr.msk.bf16.mxu0 %vm210_vm0, %v193_v20  ;;  %1116 = vmatpush3.bf16.msra.mxu0 %v1196_v34  ;;  %p1206_p13 = pneg %p1205_p12 }
  0x24   : > { %1117 = vmatprep.subr.bf16.mxu0 %v1197_v35 }
  0x25   : > { %1090 = vmatpush3.bf16.msra.mxu1 %v1191_v18  ;;  %p1213_p3 = pnand %p1212_p2, %p1206_p13 }
  0x26   : > { %1091 = vmatprep.subr.bf16.mxu1 %v1192_v30 }
  0x27   : > { %1118 = vmatpush3.bf16.msra.mxu0 %v1197_v35 }
  0x28   : > { %1119 = vmatprep.subr.bf16.mxu0 %v1198_v36 }
  0x29   : > { %1092 = vmatpush3.bf16.msra.mxu1 %v1192_v30 }
  0x2a   : > { %1074 = vmatmul.mubr.msk.bf16.gmra.mxu0 %vm210_vm0, %v194_v25  ;;  %1093 = vmatprep.subr.bf16.mxu1 %v1193_v31 }
  0x2b   : > { %1077 = vmatprep.mubr.msk.bf16.mxu0 %vm210_vm0, %v195_v26  ;;  %1120 = vmatpush3.bf16.msra.mxu0 %v1198_v36  ;;  %v903_v36 = vld [vmem:[%s1492_s2 + $0x1] ss:$0 sm:$0xff] }
  0x2c   : > { %1121 = vmatprep.subr.bf16.mxu0 %v1199_v37 }
  0x2d   : > { %1094 = vmatpush3.bf16.msra.mxu1 %v1193_v31  ;;  %v1200_v31 = vld [vmem:[%s1491_s1 + $0x90] sm:$0xff]  }
  0x2e   : > { %1095 = vmatprep.subr.bf16.mxu1 %v1194_v32 }
  0x2f   : > { %1122 = vmatpush3.bf16.msra.mxu0 %v1199_v37 }
  0x30   : > { %1123 = vmatprep.subr.bf16.mxu0 %v1200_v31 }
  0x31   : > { %1096 = vmatpush3.bf16.msra.mxu1 %v1194_v32  ;;  %v1201_v32 = vld [vmem:[%s1491_s1 + $0x88] sm:$0xff]  }
  0x32   : > { %1078 = vmatmul.mubr.msk.bf16.gmra.mxu0 %vm210_vm0, %v196_v29 }
  0x33   : > { %1124 = vmatpush3.bf16.msra.mxu0 %v1200_v31 }
  0x34   : > { %1125 = vmatprep.subr.bf16.mxu0 %v1201_v32 }
  0x37   : > { %1126 = vmatpush3.bf16.msra.mxu0 %v1201_v32 }
  0x38   : > { %1127 = vmatprep.subr.bf16.mxu0 %v1202_v33 }
  0x3b   : > { %1128 = vmatpush3.bf16.msra.mxu0 %v1202_v33 }
  0xda   : > { %v1067_v38 = vpop.f32.mrf.mxu0 }
  0xdb   : > { %v278_v44 = vadd.f32 %v1067_v38, %v877_v40 }
  0xdc   : > { %v269_v39 = vpop.f32.mrf.mxu0 }
  0xdd   : > { %v270_v42 = vadd.f32 %v877_v40, %v269_v39  ;;  %v334_v51 = vmax.f32 %v278_v44, 0.0 }
  0xde   : > { %v1068_v41 = vpop.f32.mrf.mxu0 }
  0xdf   : > { %v281_v43 = vadd.f32 %v1068_v41, %v877_v40  ;;  %v332_v49 = vmax.f32 %v270_v42, 0.0 }
  0xe0   : > { %v272_v45 = vpop.f32.mrf.mxu0 }
  0xe1   : > { %v273_v46 = vadd.f32 %v877_v40, %v272_v45  ;;  %v335_v47 = vmax.f32 %v281_v43, 0.0 }
  0xe2   : > { %v1071_v48 = vpop.f32.mrf.mxu0 }
  0xe3   : > { %v333_v50 = vmax.f32 %v273_v46, 0.0  ;;  %v349_v54 = vpack.c.bf16 %v335_v47, %v334_v51  ;;  %v294_v58 = vadd.f32 %v1071_v48, %v877_v40 }
  0xe4   : > { %v285_v52 = vpop.f32.mrf.mxu0 }
  0xe5   : > { %v348_v53 = vpack.c.bf16 %v333_v50, %v332_v49  ;;  %v286_v56 = vadd.f32 %v877_v40, %v285_v52  ;;  %v338_v1 = vmax.f32 %v294_v58, 0.0 }
  0xe6   : > { %v1072_v55 = vpop.f32.mrf.mxu0 }
  0xe7   : > { %v297_v57 = vadd.f32 %v1072_v55, %v877_v40  ;;  %1097 = vmatprep.mubr.bf16.mxu1 %v348_v53  ;;  %v336_v63 = vmax.f32 %v286_v56, 0.0 }
  0xe8   : > { %v288_v59 = vpop.f32.mrf.mxu0  ;;  %1098 = vmatmul.mubr.bf16.vlgmr.msra.gmra.mxu1 %v349_v54 }
  0xe9   : > { %v289_v60 = vadd.f32 %v877_v40, %v288_v59  ;;  %v339_v61 = vmax.f32 %v297_v57, 0.0 }
  0xea   : > { %v1075_v62 = vpop.f32.mrf.mxu0 }
  0xeb   : > { %v337_v0 = vmax.f32 %v289_v60, 0.0  ;;  %v351_v4 = vpack.c.bf16 %v339_v61, %v338_v1  ;;  %v310_v8 = vadd.f32 %v1075_v62, %v877_v40 }
  0xec   : > { %v301_v2 = vpop.f32.mrf.mxu0 }
  0xed   : > { %v350_v3 = vpack.c.bf16 %v337_v0, %v336_v63  ;;  %v302_v6 = vadd.f32 %v877_v40, %v301_v2  ;;  %v342_v15 = vmax.f32 %v310_v8, 0.0 }
  0xee   : > { %v1076_v5 = vpop.f32.mrf.mxu0 }
  0xef   : > { %v313_v7 = vadd.f32 %v1076_v5, %v877_v40  ;;  %1101 = vmatprep.mubr.bf16.mxu1 %v350_v3  ;;  %v340_v13 = vmax.f32 %v302_v6, 0.0 }
  0xf0   : > { %v304_v9 = vpop.f32.mrf.mxu0  ;;  %1102 = vmatmul.mubr.bf16.gmra.mxu1 %v351_v4 }
  0xf1   : > { %v305_v10 = vadd.f32 %v877_v40, %v304_v9  ;;  %v343_v11 = vmax.f32 %v313_v7, 0.0 }
  0xf2   : > { %v1079_v12 = vpop.f32.mrf.mxu0 }
  0xf3   : > { %v341_v14 = vmax.f32 %v305_v10, 0.0  ;;  %v353_v18 = vpack.c.bf16 %v343_v11, %v342_v15  ;;  %v326_v22 = vadd.f32 %v1079_v12, %v877_v40 }
  0xf4   : > { %v317_v16 = vpop.f32.mrf.mxu0 }
  0xf5   : > { %v352_v17 = vpack.c.bf16 %v341_v14, %v340_v13  ;;  %v318_v20 = vadd.f32 %v877_v40, %v317_v16  ;;  %v346_v28 = vmax.f32 %v326_v22, 0.0 }
  0xf6   : > { %v1080_v19 = vpop.f32.mrf.mxu0 }
  0xf7   : > { %v329_v21 = vadd.f32 %v1080_v19, %v877_v40  ;;  %1105 = vmatprep.mubr.bf16.mxu1 %v352_v17  ;;  %v344_v26 = vmax.f32 %v318_v20, 0.0 }
  0xf8   : > { %v320_v23 = vpop.f32.mrf.mxu0  ;;  %1106 = vmatmul.mubr.bf16.gmra.mxu1 %v353_v18 }
  0xf9   : > { %v321_v24 = vadd.f32 %v877_v40, %v320_v23  ;;  %v347_v25 = vmax.f32 %v329_v21, 0.0 }
  0xfb   : > { %v345_v27 = vmax.f32 %v321_v24, 0.0  ;;  %v355_v30 = vpack.c.bf16 %v347_v25, %v346_v28  ;;  %v928_v28 = vld [vmem:[%s1492_s2 + $0x2] ss:$0 sm:$0xff] }
  0xfd   : > { %v354_v29 = vpack.c.bf16 %v345_v27, %v344_v26 }
  0xff   : > { %1109 = vmatprep.mubr.bf16.mxu1 %v354_v29 }
 0x100   : > { %1110 = vmatmul.mubr.bf16.gmra.mxu1 %v355_v30 }
 0x1a8   : > { %v1099_v34 = vpop.f32.mrf.mxu1 }
 0x1a9   : > { %v469_v40 = vadd.f32 %v1099_v34, %v903_v36 }
 0x1aa   : > { %v460_v35 = vpop.f32.mrf.mxu1 }
 0x1ab   : > { %v461_v38 = vadd.f32 %v903_v36, %v460_v35  ;;  %v525_v47 = vmax.f32 %v469_v40, 0.0 }
 0x1ac   : > { %v1100_v37 = vpop.f32.mrf.mxu1 }
 0x1ad   : > { %v472_v39 = vadd.f32 %v1100_v37, %v903_v36  ;;  %v523_v45 = vmax.f32 %v461_v38, 0.0 }
 0x1ae   : > { %v463_v41 = vpop.f32.mrf.mxu1 }
 0x1af   : > { %v464_v42 = vadd.f32 %v903_v36, %v463_v41  ;;  %v526_v43 = vmax.f32 %v472_v39, 0.0 }
 0x1b0   : > { %v1103_v44 = vpop.f32.mrf.mxu1 }
 0x1b1   : > { %v524_v46 = vmax.f32 %v464_v42, 0.0  ;;  %v540_v50 = vpack.c.bf16 %v526_v43, %v525_v47  ;;  %v485_v54 = vadd.f32 %v1103_v44, %v903_v36 }
 0x1b2   : > { %v476_v48 = vpop.f32.mrf.mxu1 }
 0x1b3   : > { %v539_v49 = vpack.c.bf16 %v524_v46, %v523_v45  ;;  %v477_v52 = vadd.f32 %v903_v36, %v476_v48  ;;  %v529_v61 = vmax.f32 %v485_v54, 0.0 }
 0x1b4   : > { %v1104_v51 = vpop.f32.mrf.mxu1 }
 0x1b5   : > { %v488_v53 = vadd.f32 %v1104_v51, %v903_v36  ;;  %1129 = vmatprep.mubr.bf16.mxu0 %v539_v49  ;;  %v527_v59 = vmax.f32 %v477_v52, 0.0 }
 0x1b6   : > { %v479_v55 = vpop.f32.mrf.mxu1  ;;  %1130 = vmatmul.mubr.bf16.vlgmr.msra.gmra.mxu0 %v540_v50 }
 0x1b7   : > { %v480_v56 = vadd.f32 %v903_v36, %v479_v55  ;;  %v530_v57 = vmax.f32 %v488_v53, 0.0 }
 0x1b8   : > { %v1107_v58 = vpop.f32.mrf.mxu1 }
 0x1b9   : > { %v528_v60 = vmax.f32 %v480_v56, 0.0  ;;  %v542_v0 = vpack.c.bf16 %v530_v57, %v529_v61  ;;  %v501_v4 = vadd.f32 %v1107_v58, %v903_v36 }
 0x1ba   : > { %v492_v62 = vpop.f32.mrf.mxu1 }
 0x1bb   : > { %v541_v63 = vpack.c.bf16 %v528_v60, %v527_v59  ;;  %v493_v2 = vadd.f32 %v903_v36, %v492_v62  ;;  %v533_v11 = vmax.f32 %v501_v4, 0.0 }
 0x1bc   : > { %v1108_v1 = vpop.f32.mrf.mxu1 }
 0x1bd   : > { %v504_v3 = vadd.f32 %v1108_v1, %v903_v36  ;;  %1133 = vmatprep.mubr.bf16.mxu0 %v541_v63  ;;  %v531_v9 = vmax.f32 %v493_v2, 0.0 }
 0x1be   : > { %v495_v5 = vpop.f32.mrf.mxu1  ;;  %1134 = vmatmul.mubr.bf16.gmra.mxu0 %v542_v0 }
 0x1bf   : > { %v496_v6 = vadd.f32 %v903_v36, %v495_v5  ;;  %v534_v7 = vmax.f32 %v504_v3, 0.0 }
 0x1c0   : > { %v1111_v8 = vpop.f32.mrf.mxu1 }
 0x1c1   : > { %v532_v10 = vmax.f32 %v496_v6, 0.0  ;;  %v544_v14 = vpack.c.bf16 %v534_v7, %v533_v11  ;;  %v517_v18 = vadd.f32 %v1111_v8, %v903_v36 }
 0x1c2   : > { %v508_v12 = vpop.f32.mrf.mxu1 }
 0x1c3   : > { %v543_v13 = vpack.c.bf16 %v532_v10, %v531_v9  ;;  %v509_v16 = vadd.f32 %v903_v36, %v508_v12  ;;  %v537_v24 = vmax.f32 %v517_v18, 0.0 }
 0x1c4   : > { %v1112_v15 = vpop.f32.mrf.mxu1 }
 0x1c5   : > { %v520_v17 = vadd.f32 %v1112_v15, %v903_v36  ;;  %1137 = vmatprep.mubr.bf16.mxu0 %v543_v13  ;;  %v535_v22 = vmax.f32 %v509_v16, 0.0 }
 0x1c6   : > { %v511_v19 = vpop.f32.mrf.mxu1  ;;  %1138 = vmatmul.mubr.bf16.gmra.mxu0 %v544_v14 }
 0x1c7   : > { %v512_v20 = vadd.f32 %v903_v36, %v511_v19  ;;  %v538_v21 = vmax.f32 %v520_v17, 0.0 }
 0x1c9   : > { %v536_v23 = vmax.f32 %v512_v20, 0.0  ;;  %v546_v26 = vpack.c.bf16 %v538_v21, %v537_v24 }
 0x1cb   : > { %v545_v25 = vpack.c.bf16 %v536_v23, %v535_v22 }
 0x1cd   : > { %1141 = vmatprep.mubr.bf16.mxu0 %v545_v25 }
 0x1ce   : > { %1142 = vmatmul.mubr.bf16.gmra.mxu0 %v546_v26 }
 0x276   : > { %v1131_v27 = vpop.f32.mrf.mxu0 }
 0x277   : > { %v660_v31 = vadd.f32 %v1131_v27, %v928_v28 }
 0x278   : > { %v651_v29 = vpop.f32.mrf.mxu0 }
 0x279   : > { %v652_v34 = vadd.f32 %v928_v28, %v651_v29 }
 0x27a   : > { %v1132_v30 = vpop.f32.mrf.mxu0 }
 0x27b   : > { %v663_v32 = vadd.f32 %v1132_v30, %v928_v28 }
 0x27c   : > { %v654_v33 = vpop.f32.mrf.mxu0 }
 0x27d   : > { %v983_v35 = vpack.c.bf16 %v663_v32, %v660_v31  ;;  %v655_v36 = vadd.f32 %v928_v28, %v654_v33 }
 0x27e   : > { %v1135_v37 = vpop.f32.mrf.mxu0 }
 0x27f   : > { %1015 = vst [vmem:[%s1429_s8 + $0x8] sm:$0xff] %v983_v35   ;;  %v978_v38 = vpack.c.bf16 %v655_v36, %v652_v34  ;;  %v676_v41 = vadd.f32 %v1135_v37, %v928_v28 }
 0x280   : > { %v667_v39 = vpop.f32.mrf.mxu0 }
 0x281   : > { %979 = vst [vmem:[%s1429_s8] sm:$0xff] %v978_v38   ;;  %v668_v44 = vadd.f32 %v928_v28, %v667_v39 }
 0x282   : > { %v1136_v40 = vpop.f32.mrf.mxu0 }
 0x283   : > { %v679_v42 = vadd.f32 %v1136_v40, %v928_v28 }
 0x284   : > { %v670_v43 = vpop.f32.mrf.mxu0 }
 0x285   : > { %v993_v45 = vpack.c.bf16 %v679_v42, %v676_v41  ;;  %v671_v46 = vadd.f32 %v928_v28, %v670_v43 }
 0x286   : > { %v1139_v47 = vpop.f32.mrf.mxu0 }
 0x287   : > { %1017 = vst [vmem:[%s1429_s8 + $0x18] sm:$0xff] %v993_v45   ;;  %v988_v48 = vpack.c.bf16 %v671_v46, %v668_v44  ;;  %v692_v51 = vadd.f32 %v1139_v47, %v928_v28 }
 0x288   : > { %v683_v49 = vpop.f32.mrf.mxu0 }
 0x289   : > { %1016 = vst [vmem:[%s1429_s8 + $0x10] sm:$0xff] %v988_v48   ;;  %v684_v54 = vadd.f32 %v928_v28, %v683_v49 }
 0x28a   : > { %v1140_v50 = vpop.f32.mrf.mxu0 }
 0x28b   : > { %v695_v52 = vadd.f32 %v1140_v50, %v928_v28 }
 0x28c   : > { %v686_v53 = vpop.f32.mrf.mxu0 }
 0x28d   : > { %v1003_v55 = vpack.c.bf16 %v695_v52, %v692_v51  ;;  %v687_v56 = vadd.f32 %v928_v28, %v686_v53 }
 0x28e   : > { %v1143_v57 = vpop.f32.mrf.mxu0 }
 0x28f   : > { %1019 = vst [vmem:[%s1429_s8 + $0x28] sm:$0xff] %v1003_v55   ;;  %v998_v58 = vpack.c.bf16 %v687_v56, %v684_v54  ;;  %v708_v61 = vadd.f32 %v1143_v57, %v928_v28 }
 0x290   : > { %v699_v59 = vpop.f32.mrf.mxu0 }
 0x291   : > { %1018 = vst [vmem:[%s1429_s8 + $0x20] sm:$0xff] %v998_v58   ;;  %v700_v0 = vadd.f32 %v928_v28, %v699_v59 }
 0x292   : > { %v1144_v60 = vpop.f32.mrf.mxu0 }
 0x293   : > { %v711_v62 = vadd.f32 %v1144_v60, %v928_v28 }
 0x294   : > { %v702_v63 = vpop.f32.mrf.mxu0 }
 0x295   : > { %v1013_v1 = vpack.c.bf16 %v711_v62, %v708_v61  ;;  %v703_v2 = vadd.f32 %v928_v28, %v702_v63 }
 0x297   : > { %1021 = vst [vmem:[%s1429_s8 + $0x38] sm:$0xff] %v1013_v1   ;;  %v1008_v3 = vpack.c.bf16 %v703_v2, %v700_v0 }
 0x299   : > { %1020 = vst [vmem:[%s1429_s8 + $0x30] sm:$0xff] %v1008_v3  }
 0x29a   : > { %1216 = shalt.err (!%p1213_p3)
}
 0x29b   : > { %s1217_s27 = scalar_lea.hbm %s1442_s19, 1024  ;;  %s1221_s30 = scalar_lea.hbm %s1493_s3, 2048 }
 0x29c   : > { %p1218_p4 = scmp.ne.s32.totalorder %s1442_s19, %s1217_s27  ;;  %p1222_p9 = scmp.lt.s32.totalorder %s1442_s19, %s1493_s3 }
 0x29d   : > { %p1223_p10 = scmp.lt.s32.totalorder %s1221_s30, %s1217_s27 }
 0x29e   : > { %p1219_p7 = pnand %p1218_p4, %p1326_p5 }
 0x29f   : > { %p1224_p11 = por %p1223_p10, %p1222_p9 }
 0x2a0   : > { %p1220_p8 = pneg %p1219_p7 }
 0x2a2   : > { %p1225_p12 = pnand %p1224_p11, %p1220_p8 }
 0x2a4   : > { %1228 = shalt.err (!%p1225_p12)
}
 0x2a5   : > { %s1266_s6 = smov 64   ;;  %s1267_s7 = smov 4  }
 0x2a6   : > { %1145 = dma.vmem_to_hbm [thread:$0]  (%p1326_p5), %s1444_s10, 1024, %s1442_s19, %s1450_s16, %s1266_s6, %s1266_s6, %s1267_s7  }
 0x2a7 PF: > { %p1151_p13 = scmp.ge.s32.totalorder %s1263_s15, 2  ;;  %s823_s8 = sand.u32 1, %s1251_s12  }
 0x2a8   : > { %s824_s9 = scalar_lea.sflag [#allocation3], %s823_s8 }
 0x2a9   : > { %p1148_p0 = pnand %p1151_p13, %p1330_p6 }
 0x2ab   : > { %p1149_p1 = pneg %p1148_p0 }
 0x2ad   : > { %1246 = dma.done.wait (%p1149_p1), %s824_s9, 1024  }
 0x2ae   : > { %1248 = vsyncadd (%p1149_p1), %s824_s9, 4294966272  ;;  %p13_p2 = scmp.ge.s32.totalorder %s1313_s18, 4   ;;  %s1496_s12 = smov %s1255_s13 }
 0x2af   : > { %s1497_s13 = smov %s1259_s14  ;;  %s1498_s14 = smov %s1324_s21 }
 0x2b0   : > { %s1499_s15 = smov %s1313_s18  ;;  %15 = sbr.rel (!%p13_p2) target bundleno = 3 (0x3), region = 69 }
 0x2b5   :  { %829 = vsyncpa [#allocation3], 1 }
 0x2b6   :  { %831 = vsyncpa [#allocation3 + $0x1], 1 }

</bundles_post_ra>
